<compile_context>
chip_gen: v5e
topology: v5e:2x2
jax: 0.10.0
libtpu: 0.0.40
codegen_flags: <defaults>
</compile_context>

<pallas_src>
import jax
import jax.numpy as jnp
from jax.experimental import pallas as pl
from jax.experimental.pallas import tpu as pltpu

CLIPMIN = 1e-5
CLIPMAX = 1e4


def mix_affine_quant_kernel(x_ref, nbits_ref, o_ref):
    # Single tile load; one f32 compute copy.
    x = x_ref[...].astype(jnp.float32)                                 # (tr, C)
    n_bits = jnp.clip(nbits_ref[...].astype(jnp.float32), 2.0, 8.0)    # (tr, 1)

    # Per-row min/max over the lane axis (XLU slot, off the VPU critical path).
    # TODO(synk): on v6e/v7x this reduction could run on the native bf16 block
    # (exact selection) to shave part of the unpack pass; kept on the f32 copy
    # for lowering safety across all generations.
    xmin = jnp.min(x, axis=-1, keepdims=True)
    xmax = jnp.max(x, axis=-1, keepdims=True)

    n_low = jnp.floor(n_bits)
    n_high = jnp.ceil(n_bits)
    high_prop = n_bits - n_low

    # Exact 2**n - 1 (n in [2, 8]) via integer shift; no pow/exp2 ulp risk.
    qmax_low = jnp.left_shift(1, n_low.astype(jnp.int32)).astype(jnp.float32) - 1.0
    qmax_high = jnp.left_shift(1, n_high.astype(jnp.int32)).astype(jnp.float32) - 1.0

    # Asymmetric (symmetric=False) scales / zero-points — all per-row, O(rows).
    rng = xmax - xmin
    scale_low = jnp.clip(rng / qmax_low, CLIPMIN, CLIPMAX)
    scale_high = jnp.clip(rng / qmax_high, CLIPMIN, CLIPMAX)
    inv_low = 1.0 / scale_low            # per-row exact reciprocal (cheap)
    inv_high = 1.0 / scale_high
    rzp_low = jnp.round(jnp.clip(-xmin / scale_low, -CLIPMAX, CLIPMAX))
    rzp_high = jnp.round(jnp.clip(-xmin / scale_high, -CLIPMAX, CLIPMAX))

    # fake_quant with the zero-point folded into the clip bounds (exact: rzp is
    # an integer and the active range stays far below 2**24):
    #   clip(round(x/s) + z, 0, q) - z  ==  clip(round(x/s), -z, q - z)
    clip_low = jnp.clip(jnp.round(x * inv_low), -rzp_low, qmax_low - rzp_low)
    clip_high = jnp.clip(jnp.round(x * inv_high), -rzp_high, qmax_high - rzp_high)

    # Fold scale and mixing weight into two per-row coefficients:
    #   low_prop*(clip_lo*scale_lo) + high_prop*(clip_hi*scale_hi)
    #   == (low_prop*scale_lo)*clip_lo + (high_prop*scale_hi)*clip_hi
    coef_low = (1.0 - high_prop) * scale_low       # per-row
    coef_high = high_prop * scale_high             # per-row
    o_ref[...] = (coef_low * clip_low + coef_high * clip_high).astype(o_ref.dtype)


def _row_align(dtype):
    itemsize = jnp.dtype(dtype).itemsize
    return {4: 8, 2: 16, 1: 32}.get(itemsize, 8)


def _vmem_budget_bytes():
    """Generation-aware (tile budget, scoped-vmem cap)."""
    cap = None
    try:
        cap = pltpu.get_tpu_info().vmem_capacity_bytes
    except Exception:
        cap = None
    if cap is not None and cap <= (96 << 20):      # 64 MiB/TC parts (v7x)
        return 14 << 20, 40 << 20
    return 24 << 20, 48 << 20                      # 128 MiB parts (v5e/v6e)


def _choose_tile_r(R, C, dtype, budget_bytes, max_tile_r=2048):
    """Largest row tile that (a) keeps double-buffered in/out tiles + f32
    temporaries under the per-generation VMEM budget, (b) leaves >=2 (ideally
    >=4) grid steps so rows shard across both v7x TensorCores and the DMA
    pipeline stays full, (c) respects sublane packing. Ragged tails are handled
    by a cdiv grid + Pallas masking, so no divisibility is required."""
    itemsize = jnp.dtype(dtype).itemsize
    align = _row_align(dtype)
    # 2x double-buffered input + 2x output (native dtype) + ~3 row-wide f32
    # temporaries (f32 copy of x, clip_low/high) + lane-padded per-row vectors.
    bytes_per_row = 4 * C * itemsize + 3 * C * 4 + 8 * 128 * 4
    budget_rows = max(align, budget_bytes // bytes_per_row)
    if R >= 4 * align:
        par_cap = R // 4                           # guarantees >= 4 grid steps
    elif R >= 2 * align:
        par_cap = R // 2                           # guarantees >= 2 grid steps
    else:
        return R                                   # tiny matrix: single block
    tile_r = min(budget_rows, par_cap, max_tile_r)
    return max(align, (tile_r // align) * align)


def mix_affine_quantize(x, n_bits, tile_r=None, interpret=False):
    assert x.ndim == 2, "kernel implements the 2-D per-row default config"
    R, C = x.shape
    assert n_bits.shape == (R, 1)

    budget_bytes, vmem_cap = _vmem_budget_bytes()
    if tile_r is None:
        tile_r = _choose_tile_r(R, C, x.dtype, budget_bytes)
    grid_r = pl.cdiv(R, tile_r)                    # ragged last block is masked

    itemsize = jnp.dtype(x.dtype).itemsize
    est_vmem = 4 * tile_r * C * itemsize + 3 * tile_r * C * 4 + 8 * tile_r * 128 * 4
    vmem_limit = int(min(max(est_vmem + (8 << 20), 16 << 20), vmem_cap))

    return pl.pallas_call(
        mix_affine_quant_kernel,
        out_shape=jax.ShapeDtypeStruct((R, C), x.dtype),
        grid_spec=pltpu.PrefetchScalarGridSpec(
            num_scalar_prefetch=0,
            grid=(grid_r,),
            in_specs=[
                pl.BlockSpec((tile_r, C), lambda i: (i, 0)),
                pl.BlockSpec((tile_r, 1), lambda i: (i, 0)),
            ],
            out_specs=pl.BlockSpec((tile_r, C), lambda i: (i, 0)),
        ),
        compiler_params=pltpu.CompilerParams(
            dimension_semantics=("parallel",),
            vmem_limit_bytes=vmem_limit),
        interpret=interpret,
    )(x, n_bits)


def mix_affine_quantize_ref(x, n_bits):
    """Pure-JAX reference matching the PyTorch forward (default config)."""
    x = x.astype(jnp.float32)
    n_bits = jnp.clip(n_bits.astype(jnp.float32), 2.0, 8.0)
    xmin = jnp.min(x, axis=-1, keepdims=True)
    xmax = jnp.max(x, axis=-1, keepdims=True)
    n_low = jnp.floor(n_bits)
    n_high = jnp.ceil(n_bits)
    qmax_low = jnp.left_shift(1, n_low.astype(jnp.int32)).astype(jnp.float32) - 1.0
    qmax_high = jnp.left_shift(1, n_high.astype(jnp.int32)).astype(jnp.float32) - 1.0
    high_prop = n_bits - n_low
    low_prop = 1.0 - high_prop
    rng = xmax - xmin
    scale_low = jnp.clip(rng / qmax_low, CLIPMIN, CLIPMAX)
    scale_high = jnp.clip(rng / qmax_high, CLIPMIN, CLIPMAX)
    rzp_low = jnp.round(jnp.clip(-xmin / scale_low, -CLIPMAX, CLIPMAX))
    rzp_high = jnp.round(jnp.clip(-xmin / scale_high, -CLIPMAX, CLIPMAX))

    def fq(scale, rzp, qmax):
        xi = jnp.clip(jnp.round(x / scale) + rzp, 0.0, qmax)
        return (xi - rzp) * scale

    return low_prop * fq(scale_low, rzp_low, qmax_low) + high_prop * fq(
        scale_high, rzp_high, qmax_high)


def _check(out, ref, x, atol, rtol):
    out = jnp.asarray(out, jnp.float32)
    ref = jnp.asarray(ref, jnp.float32)
    xf = jnp.asarray(x, jnp.float32)
    diff = jnp.abs(out - ref)
    tol = atol + rtol * jnp.abs(ref)
    frac_bad = float(jnp.mean((diff > tol).astype(jnp.float32)))
    # x*inv_scale vs the reference's x/scale can (extremely rarely) flip a
    # round-half tie; that moves the result by exactly one quantization step on
    # that row. Allow a tiny fraction of such flips, never anything larger.
    step = (jnp.max(xf, axis=-1, keepdims=True)
            - jnp.min(xf, axis=-1, keepdims=True)) / 3.0 + atol   # qmax_low >= 3
    max_ok = bool(jnp.all(diff <= step))
    return (frac_bad < 5e-3) and max_ok


if __name__ == "__main__":
    key = jax.random.PRNGKey(0)
    k_x, k_b, k_x2, k_b2 = jax.random.split(key, 4)

    target_bit = 4

    # --- case 1: aligned [32, 256] weight-like matrix, f32 and bf16 I/O ---
    R, C = 32, 256
    # module __init__: n_bits = target_bit + 0.5 + rand/4, shape (shape[0], 1)
    n_bits = (jnp.ones((R, 1), jnp.float32) * target_bit + 0.5
              + jax.random.uniform(k_b, (R, 1), jnp.float32) / 4.0)

    x32 = jax.random.normal(k_x, (R, C), dtype=jnp.float32)
    out32 = jax.block_until_ready(mix_affine_quantize(x32, n_bits))
    ref32 = mix_affine_quantize_ref(x32, n_bits)
    assert _check(out32, ref32, x32, atol=1e-5, rtol=1e-5), "f32 mismatch vs reference"

    # bf16 path: stream bf16 through HBM; compute stays f32 inside the kernel
    x16 = x32.astype(jnp.bfloat16)
    out16 = jax.block_until_ready(mix_affine_quantize(x16, n_bits))
    ref16 = mix_affine_quantize_ref(x16, n_bits).astype(jnp.bfloat16)
    assert _check(out16, ref16, x16, atol=3e-2, rtol=2e-2), "bf16 mismatch vs reference"

    # --- case 2: non-aligned row count (exercises the cdiv-masked last block) ---
    R2, C2 = 37, 384
    n_bits2 = (jnp.ones((R2, 1), jnp.float32) * target_bit + 0.5
               + jax.random.uniform(k_b2, (R2, 1), jnp.float32) / 4.0)
    x2 = jax.random.normal(k_x2, (R2, C2), dtype=jnp.float32)
    out2 = jax.block_until_ready(mix_affine_quantize(x2, n_bits2))
    ref2 = mix_affine_quantize_ref(x2, n_bits2)
    assert _check(out2, ref2, x2, atol=1e-5, rtol=1e-5), "ragged f32 mismatch vs reference"

    print("KERNEL_OK")
</pallas_src>

<mosaic_0001>
module attributes {stable_mosaic.version = 11 : i64} {
  func.func @mix_affine_quant_kernel(%arg0: i32, %arg1: memref<8x256xf32, #tpu.memory_space<vmem>>, %arg2: memref<8x1xf32, #tpu.memory_space<vmem>>, %arg3: memref<8x256xf32, #tpu.memory_space<vmem>>) attributes {dimension_semantics = [#tpu.dimension_semantics<parallel>], iteration_bounds = array<i64: 4>, scalar_prefetch = 0 : i64, scratch_operands = 0 : i64, tpu.core_type = #tpu.core_type<tc>, window_params = [{transform_indices = @transform_0, window_bounds = array<i64: 8, 256>}, {transform_indices = @transform_1, window_bounds = array<i64: 8, 1>}, {transform_indices = @transform_2, window_bounds = array<i64: 8, 256>}]} {
    %c0 = arith.constant 0 : index
    %c0_0 = arith.constant 0 : index
    %0 = vector.load %arg1[%c0, %c0_0] : memref<8x256xf32, #tpu.memory_space<vmem>>, vector<8x256xf32>
    %c0_1 = arith.constant 0 : index
    %c0_2 = arith.constant 0 : index
    %1 = vector.load %arg2[%c0_1, %c0_2] : memref<8x1xf32, #tpu.memory_space<vmem>>, vector<8x1xf32>
    %cst = arith.constant 2.000000e+00 : f32
    %cst_3 = arith.constant 8.000000e+00 : f32
    %2 = vector.broadcast %cst : f32 to vector<8x1xf32>
    %3 = arith.maximumf %2, %1 : vector<8x1xf32>
    %4 = vector.broadcast %cst_3 : f32 to vector<8x1xf32>
    %5 = arith.minimumf %4, %3 : vector<8x1xf32>
    %cst_4 = arith.constant dense<0x7F800000> : vector<8xf32>
    %6 = vector.multi_reduction <minimumf>, %0, %cst_4 [1] : vector<8x256xf32> to vector<8xf32>
    %7 = vector.shape_cast %6 : vector<8xf32> to vector<8x1xf32>
    %cst_5 = arith.constant dense<0xFF800000> : vector<8xf32>
    %8 = vector.multi_reduction <maximumf>, %0, %cst_5 [1] : vector<8x256xf32> to vector<8xf32>
    %9 = vector.shape_cast %8 : vector<8xf32> to vector<8x1xf32>
    %10 = math.floor %5 : vector<8x1xf32>
    %11 = math.ceil %5 : vector<8x1xf32>
    %12 = arith.subf %5, %10 : vector<8x1xf32>
    %13 = arith.fptosi %10 : vector<8x1xf32> to vector<8x1xi32>
    %c1_i32 = arith.constant 1 : i32
    %14 = vector.broadcast %c1_i32 : i32 to vector<8x1xi32>
    %15 = arith.shli %14, %13 : vector<8x1xi32>
    %16 = arith.sitofp %15 : vector<8x1xi32> to vector<8x1xf32>
    %cst_6 = arith.constant 1.000000e+00 : f32
    %17 = vector.broadcast %cst_6 : f32 to vector<8x1xf32>
    %18 = arith.subf %16, %17 : vector<8x1xf32>
    %19 = arith.fptosi %11 : vector<8x1xf32> to vector<8x1xi32>
    %c1_i32_7 = arith.constant 1 : i32
    %20 = vector.broadcast %c1_i32_7 : i32 to vector<8x1xi32>
    %21 = arith.shli %20, %19 : vector<8x1xi32>
    %22 = arith.sitofp %21 : vector<8x1xi32> to vector<8x1xf32>
    %cst_8 = arith.constant 1.000000e+00 : f32
    %23 = vector.broadcast %cst_8 : f32 to vector<8x1xf32>
    %24 = arith.subf %22, %23 : vector<8x1xf32>
    %25 = arith.subf %9, %7 : vector<8x1xf32>
    %26 = arith.divf %25, %18 : vector<8x1xf32>
    %cst_9 = arith.constant 9.99999974E-6 : f32
    %cst_10 = arith.constant 1.000000e+04 : f32
    %27 = vector.broadcast %cst_9 : f32 to vector<8x1xf32>
    %28 = arith.maximumf %27, %26 : vector<8x1xf32>
    %29 = vector.broadcast %cst_10 : f32 to vector<8x1xf32>
    %30 = arith.minimumf %29, %28 : vector<8x1xf32>
    %31 = arith.divf %25, %24 : vector<8x1xf32>
    %cst_11 = arith.constant 9.99999974E-6 : f32
    %cst_12 = arith.constant 1.000000e+04 : f32
    %32 = vector.broadcast %cst_11 : f32 to vector<8x1xf32>
    %33 = arith.maximumf %32, %31 : vector<8x1xf32>
    %34 = vector.broadcast %cst_12 : f32 to vector<8x1xf32>
    %35 = arith.minimumf %34, %33 : vector<8x1xf32>
    %cst_13 = arith.constant 1.000000e+00 : f32
    %36 = vector.broadcast %cst_13 : f32 to vector<8x1xf32>
    %37 = arith.divf %36, %30 : vector<8x1xf32>
    %cst_14 = arith.constant 1.000000e+00 : f32
    %38 = vector.broadcast %cst_14 : f32 to vector<8x1xf32>
    %39 = arith.divf %38, %35 : vector<8x1xf32>
    %cst_15 = arith.constant 0.000000e+00 : f32
    %40 = vector.broadcast %cst_15 : f32 to vector<8x1xf32>
    %41 = arith.subf %40, %7 : vector<8x1xf32>
    %42 = arith.divf %41, %30 : vector<8x1xf32>
    %cst_16 = arith.constant -1.000000e+04 : f32
    %cst_17 = arith.constant 1.000000e+04 : f32
    %43 = vector.broadcast %cst_16 : f32 to vector<8x1xf32>
    %44 = arith.maximumf %43, %42 : vector<8x1xf32>
    %45 = vector.broadcast %cst_17 : f32 to vector<8x1xf32>
    %46 = arith.minimumf %45, %44 : vector<8x1xf32>
    %47 = math.roundeven %46 : vector<8x1xf32>
    %cst_18 = arith.constant 0.000000e+00 : f32
    %48 = vector.broadcast %cst_18 : f32 to vector<8x1xf32>
    %49 = arith.subf %48, %7 : vector<8x1xf32>
    %50 = arith.divf %49, %35 : vector<8x1xf32>
    %cst_19 = arith.constant -1.000000e+04 : f32
    %cst_20 = arith.constant 1.000000e+04 : f32
    %51 = vector.broadcast %cst_19 : f32 to vector<8x1xf32>
    %52 = arith.maximumf %51, %50 : vector<8x1xf32>
    %53 = vector.broadcast %cst_20 : f32 to vector<8x1xf32>
    %54 = arith.minimumf %53, %52 : vector<8x1xf32>
    %55 = math.roundeven %54 : vector<8x1xf32>
    %56 = vector.broadcast %37 : vector<8x1xf32> to vector<8x256xf32>
    %57 = arith.mulf %0, %56 : vector<8x256xf32>
    %58 = math.roundeven %57 : vector<8x256xf32>
    %cst_21 = arith.constant 0.000000e+00 : f32
    %59 = vector.broadcast %cst_21 : f32 to vector<8x1xf32>
    %60 = arith.subf %59, %47 : vector<8x1xf32>
    %61 = arith.subf %18, %47 : vector<8x1xf32>
    %62 = vector.broadcast %60 : vector<8x1xf32> to vector<8x256xf32>
    %63 = arith.maximumf %62, %58 : vector<8x256xf32>
    %64 = vector.broadcast %61 : vector<8x1xf32> to vector<8x256xf32>
    %65 = arith.minimumf %64, %63 : vector<8x256xf32>
    %66 = vector.broadcast %39 : vector<8x1xf32> to vector<8x256xf32>
    %67 = arith.mulf %0, %66 : vector<8x256xf32>
    %68 = math.roundeven %67 : vector<8x256xf32>
    %cst_22 = arith.constant 0.000000e+00 : f32
    %69 = vector.broadcast %cst_22 : f32 to vector<8x1xf32>
    %70 = arith.subf %69, %55 : vector<8x1xf32>
    %71 = arith.subf %24, %55 : vector<8x1xf32>
    %72 = vector.broadcast %70 : vector<8x1xf32> to vector<8x256xf32>
    %73 = arith.maximumf %72, %68 : vector<8x256xf32>
    %74 = vector.broadcast %71 : vector<8x1xf32> to vector<8x256xf32>
    %75 = arith.minimumf %74, %73 : vector<8x256xf32>
    %cst_23 = arith.constant 1.000000e+00 : f32
    %76 = vector.broadcast %cst_23 : f32 to vector<8x1xf32>
    %77 = arith.subf %76, %12 : vector<8x1xf32>
    %78 = arith.mulf %77, %30 : vector<8x1xf32>
    %79 = arith.mulf %12, %35 : vector<8x1xf32>
    %80 = vector.broadcast %78 : vector<8x1xf32> to vector<8x256xf32>
    %81 = arith.mulf %80, %65 : vector<8x256xf32>
    %82 = vector.broadcast %79 : vector<8x1xf32> to vector<8x256xf32>
    %83 = arith.mulf %82, %75 : vector<8x256xf32>
    %84 = arith.addf %81, %83 : vector<8x256xf32>
    %c0_24 = arith.constant 0 : index
    %c0_25 = arith.constant 0 : index
    %85 = vector.load %arg3[%c0_24, %c0_25] : memref<8x256xf32, #tpu.memory_space<vmem>>, vector<8x256xf32>
    tpu.vector_store %arg3[%c0_24, %c0_25], %84 {strides = array<i32>} : memref<8x256xf32, #tpu.memory_space<vmem>>, vector<8x256xf32>,
    return
  }
  func.func @transform_0(%arg0: i32) -> (i32, i32) {
    %c0_i32 = arith.constant 0 : i32
    %c0_i32_0 = arith.constant 0 : i32
    return %arg0, %c0_i32 : i32, i32
  }
  func.func @transform_1(%arg0: i32) -> (i32, i32) {
    %c0_i32 = arith.constant 0 : i32
    %c0_i32_0 = arith.constant 0 : i32
    return %arg0, %c0_i32 : i32, i32
  }
  func.func @transform_2(%arg0: i32) -> (i32, i32) {
    %c0_i32 = arith.constant 0 : i32
    %c0_i32_0 = arith.constant 0 : i32
    return %arg0, %c0_i32 : i32, i32
  }
}

</mosaic_0001>

<bundles_post_ra>
// kernel: tpu_custom_call.1
= control target key start
LH: loop header
LB: loop body
LE: loop exit
PB: predicated region body
PF: predicated region fallthrough
CT: control target
= control target key end

     0   :  { %7 = vsyncpa [#allocation3], 0  ;;  %s878_s0 = inlined_call_operand.hbm [shape: f32[32,256], index: 0, kind: input, shape index: {}]   ;;  %s879_s1 = inlined_call_operand.vmem [shape: f32[32,1], index: 1, kind: input, shape index: {}]   ;;  %s880_s2 = inlined_call_operand.hbm [shape: f32[32,256], index: 2, kind: output, shape index: {}]  }
   0x1   :  { %9 = vsyncpa [#allocation3 + $0x1], 0 }
   0x2   :  { %10 = vsyncpa [#allocation4], 0 }
   0x3   :  { %12 = vsyncpa [#allocation4 + $0x1], 0  ;;  %s692_s9 = smov 0   ;;  %s694_s10 = smov 0  }
   0x4   :  { %s696_s11 = smov 0   ;;  %s698_s12 = smov 0  }
   0x5 LB: > { %s713_s13 = sadd.s32 4294967295, %s673_s12   ;;  %s445_s14 = sadd.s32 4294967294, %s673_s12   ;;  %s673_s12 = sphi %s698_s12, %s893_s12   ;;  %s669_s11 = sphi %s696_s11, %s892_s11   ;;  %s665_s10 = sphi %s694_s10, %s891_s10   ;;  %s661_s9 = sphi %s692_s9, %s890_s9  }
   0x6   : > { %s717_s15 = sadd.s32 1, %s673_s12   ;;  %s25_s16 = sadd.s32 1, %s669_s11 }
   0x7   : > { %s22_s17 = ssub.s32 %s673_s12, %s717_s15  ;;  %p32_p0 = scmp.ne.s32.totalorder %s669_s11, %s665_s10 }
   0x8   : > { %p23_p1 = scmp.eq.s32.totalorder %s22_s17, 0  ;;  %p33_p2 = scmp.eq.s32.totalorder %s673_s12, 0 }
   0x9   : > { %p38_p3 = scmp.ne.s32.totalorder %s665_s10, %s661_s9  ;;  %p39_p4 = scmp.eq.s32.totalorder %s713_s13, 0 }
   0xa   : > { %s729_s18 = scalar_select %p23_p1, %s669_s11, %s25_s16  }
   0xb   : > { %p731_p5 = por %p33_p2, %p32_p0  ;;  %p735_p6 = por %p39_p4, %p38_p3 }
   0xc   : > { %p88_p7 = scmp.eq.s32.totalorder %s713_s13, 3  ;;  %p94_p8 = scmp.eq.s32.totalorder %s445_s14, 3 }
   0xd   : > { %p530_p9 = scmp.lt.s32.totalorder %s673_s12, 4  ;;  %s114_s23 = sand.u32 1, %s669_s11  }
   0xe   : > { %p741_p10 = por %p88_p7, %p32_p0  ;;  %p745_p11 = por %p94_p8, %p38_p3 }
   0xf   : > { %s464_s24 = sshll.u32 %s673_s12, 4  ;;  %s448_s25 = sshll.u32 %s114_s23, 4 }
  0x10   : > { %s123_s28 = scalar_lea.hbm %s878_s0, %s464_s24  ;;  %s118_s30 = scalar_lea.vmem [#allocation2], %s448_s25 }
  0x11   : > { %s125_s29 = sshll.u32 %s123_s28, 4  ;;  %s127_s3 = sshll.u32 %s118_s30, 4  ;;  %s126_s29 = int_to_ptr.hbm [resolvable:$true] %s125_s29  ;;  %s128_s3 = int_to_ptr.vmem [resolvable:$true] %s127_s3 }
  0x12   : > { %p756_p12 = pnand %p530_p9, %p731_p5  ;;  %p451_p13 = scmp.ge.s32.totalorder %s673_s12, 1 }
  0x13   : > { %p139_p0 = scmp.lt.s32.totalorder %s673_s12, 5  ;;  %s115_s5 = scalar_lea.sflag [#allocation3], %s114_s23 }
  0x14   : > { %s577_s6 = sshra.s32 %s126_s29, 4  ;;  %p581_p2 = pneg %p756_p12  ;;  %s578_s6 = int_to_ptr.hbm [resolvable:$true] %s577_s6 }
  0x15   : > { %s579_s7 = scalar_lea.hbm %s578_s6, 16  ;;  %s584_s16 = scalar_lea.hbm %s878_s0, 64 }
  0x16   : > { %p580_p1 = scmp.ne.s32.totalorder %s578_s6, %s579_s7  ;;  %p585_p5 = scmp.lt.s32.totalorder %s578_s6, %s878_s0 }
  0x17   : > { %p586_p7 = scmp.lt.s32.totalorder %s584_s16, %s579_s7 }
  0x18   : > { %p582_p3 = pnand %p581_p2, %p580_p1 }
  0x19   : > { %p587_p8 = por %p586_p7, %p585_p5 }
  0x1a   : > { %p583_p4 = pneg %p582_p3 }
  0x1c   : > { %p588_p9 = pnand %p587_p8, %p583_p4 }
  0x1e   : > { %591 = shalt.err (!%p588_p9)
}
  0x1f   : > { %525 = dma.hbm_to_vmem [thread:$0]  (!%p756_p12), %s126_s29, 256, %s128_s3, %s115_s5  }
  0x20   : > { %p140_p1 = pnand %p451_p13, %p139_p0 }
  0x21   : > { %s777_s23 = sand.u32 (!%p140_p1), 1, %s665_s10  }
  0x22   : > { %143 = sbr.rel (%p140_p1) target bundleno = 339 (0x153), region = 28  ;;  %s452_s24 = sshll.u32 (!%p140_p1), %s777_s23, 4 }
  0x23   : > { %s146_s25 = scalar_lea.sflag (!%p140_p1), [#allocation3], %s777_s23  ;;  %s149_s26 = scalar_lea.vmem (!%p140_p1), [#allocation2], %s452_s24 }
  0x27   : > { %652 = dma.done.wait (%p735_p6), %s146_s25, 256  }
  0x28   : > { %654 = vsyncadd (%p735_p6), %s146_s25, 4294967040  ;;  %v787_v0 = vld [vmem:[%s149_s26] sm:$0xff]  ;;  %v789_v1 = vld [vmem:[%s149_s26 + $0x8] sm:$0xff]  ;;  %p175_p12 = scmp.lt.s32.totalorder %s713_s13, 3  ;;  %v675_v11 = vmov 1   ;;  %v676_v21 = vmov 0  }
  0x29   : > { %v184_v2 = vmin.f32 %v787_v0, %v789_v1  ;;  %v187_v3 = vmax.f32 %v787_v0, %v789_v1  ;;  %566 = vset.pattern.permute.xlu1 %v676_v21  ;;  %568 = vset.pattern.permute.xlu0 %v676_v21  ;;  %s465_s3 = sshll.u32 %s713_s13, 4  ;;  %s347_s14 = scalar_lea.sflag [#allocation4], %s777_s23 }
  0x2a   : > { %s176_s27 = scalar_select %p175_p12, %s713_s13, 3  ;;  %567 = vset.pattern.permute.xlu2 %v676_v21 }
  0x2b   : > { %185 = vmin.xlane.f32.xlu0 %v184_v2  ;;  %s358_s6 = scalar_lea.hbm %s880_s2, %s465_s3  ;;  %s174_s13 = scalar_lea.vmem [#allocation5], %s452_s24 }
  0x2c   : > { %s454_s28 = sshll.u32 %s176_s27, 3  ;;  %s360_s7 = sshll.u32 %s174_s13, 4  ;;  %s361_s7 = int_to_ptr.vmem [resolvable:$true] %s360_s7 }
  0x2d   : > { %s178_s30 = scalar_lea.vmem %s879_s1, %s454_s28  ;;  %s362_s8 = sshll.u32 %s358_s6, 4  ;;  %s363_s8 = int_to_ptr.hbm [resolvable:$true] %s362_s8 }
  0x2e   : > { %v181_v4 = vld [vmem:[%s178_s30] sm:$0xff]  ;;  %s621_s16 = sshra.s32 %s363_s8, 4  ;;  %s627_s24 = scalar_lea.hbm %s880_s2, 64  ;;  %s622_s16 = int_to_ptr.hbm [resolvable:$true] %s621_s16 }
  0x2f   : > { %v182_v5 = vmax.f32 %v181_v4, 2.0  ;;  %s623_s17 = scalar_lea.hbm %s622_s16, 16  ;;  %p628_p2 = scmp.lt.s32.totalorder %s622_s16, %s880_s2 }
  0x30   : > { %p624_p6 = scmp.ne.s32.totalorder %s622_s16, %s623_s17  ;;  %p629_p3 = scmp.lt.s32.totalorder %s627_s24, %s623_s17 }
  0x31   : > { %v183_v6 = vmin.f32 %v182_v5, 8.0 }
  0x32   : > { %p625_p13 = pnand %p624_p6, %p741_p10  ;;  %p630_p4 = por %p629_p3, %p628_p2 }
  0x33   : > { %188 = vmax.xlane.f32.xlu0 %v187_v3  ;;  %v190_v7 = vfloor.f32 %v183_v6  ;;  %v191_v8 = vceil.f32 %v183_v6 }
  0x34   : > { %p626_p0 = pneg %p625_p13 }
  0x35   : > { %v467_v9 = vcvt.f32.s32 %v190_v7  ;;  %v469_v10 = vcvt.f32.s32 %v191_v8  ;;  %v806_v18 = vsub.f32 %v183_v6, %v190_v7 }
  0x36   : > { %p631_p5 = pnand %p630_p4, %p626_p0 }
  0x37   : > { %v194_v12 = vshll.u32 %v675_v11, %v467_v9  ;;  %v198_v13 = vshll.u32 %v675_v11, %v469_v10 }
  0x39   : > { %v195_v14 = vcvt.s32.f32 %v194_v12  ;;  %v199_v15 = vcvt.s32.f32 %v198_v13 }
  0x3b   : > { %v800_v16 = vadd.f32 -1.0, %v195_v14  ;;  %v802_v17 = vadd.f32 -1.0, %v199_v15 }
  0x3d   : > { %569 = vrcp.f32 %v800_v16  ;;  %vm207_vm0 = vweird.f32 %v800_v16  ;;  %vm224_vm2 = vweird.f32 %v802_v17  ;;  %v213_v29 = vand.u32 2147483648, %v800_v16 }
  0x3e   : > { %571 = vrcp.f32 %v802_v17  ;;  %v230_v30 = vand.u32 2147483648, %v802_v17  ;;  %v211_v32 = vand.u32 2147483647, %v800_v16  ;;  %v228_v34 = vand.u32 2147483647, %v802_v17 }
  0x3f   : > { %v214_v35 = vor.u32 1.1754944e-38, %v213_v29 }
  0x40   : > { %v231_v36 = vor.u32 1.1754944e-38, %v230_v30  ;;  %vm212_vm6 = vcmp.eq.f32.partialorder %v211_v32, 8.507059e+37  ;;  %vm229_vm7 = vcmp.eq.f32.partialorder %v228_v34, 8.507059e+37  ;;  %v325_v34 = vsub.f32 1.0, %v806_v18 }
  0x43   : > { %v570_v19 = vpop.eup %569 }
  0x44   : > { %v572_v20 = vpop.eup %571  ;;  %v203_v22 = vmul.f32 %v570_v19, %v800_v16  ;;  %vm208_vm1 = vweird.f32 %v570_v19 }
  0x45   : > { %v220_v23 = vmul.f32 %v572_v20, %v802_v17  ;;  %vm225_vm3 = vweird.f32 %v572_v20  ;;  %vm209_vm4 = vmor %vm207_vm0, %vm208_vm1 }
  0x46   : > { %v204_v24 = vsub.f32 1.0, %v203_v22  ;;  %vm226_vm5 = vmor %vm224_vm2, %vm225_vm3 }
  0x47   : > { %v221_v25 = vsub.f32 1.0, %v220_v23 }
  0x48   : > { %v205_v26 = vmul.f32 %v570_v19, %v204_v24 }
  0x49   : > { %v222_v27 = vmul.f32 %v572_v20, %v221_v25 }
  0x4a   : > { %v206_v31 = vadd.f32 %v570_v19, %v205_v26 }
  0x4b   : > { %v223_v33 = vadd.f32 %v572_v20, %v222_v27 }
  0x4c   : > { %v210_v37 = vsel %vm209_vm4, %v570_v19, %v206_v31 }
  0x4d   : > { %v227_v38 = vsel %vm226_vm5, %v572_v20, %v223_v33  ;;  %v215_v39 = vsel %vm212_vm6, %v214_v35, %v210_v37 }
  0x4e   : > { %v232_v40 = vsel %vm229_vm7, %v231_v36, %v227_v38 }
  0x9e   : > { %v186_v28 = vpop.xlane.xlu0 %185 }
  0x9f   : > { %v266_v2 = vsub.f32 0.0, %v186_v28 }
  0xa6   : > { %v189_v41 = vpop.xlane.xlu0 %188 }
  0xa7   : > { %v201_v42 = vsub.f32 %v189_v41, %v186_v28 }
  0xa9   : > { %v216_v43 = vmul.f32 %v215_v39, %v201_v42  ;;  %v233_v44 = vmul.f32 %v232_v40, %v201_v42 }
  0xab   : > { %v217_v45 = vmax.f32 %v216_v43, 1e-05  ;;  %v234_v46 = vmax.f32 %v233_v44, 1e-05 }
  0xad   : > { %v816_v47 = vmin.f32 %v217_v45, 10000.0  ;;  %v235_v48 = vmin.f32 %v234_v46, 10000.0 }
  0xaf   : > { %573 = vrcp.f32 %v816_v47  ;;  %v247_v54 = vand.u32 2147483648, %v816_v47  ;;  %v245_v57 = vand.u32 2147483647, %v816_v47  ;;  %v262_v58 = vand.u32 2147483648, %v235_v48 }
  0xb0   : > { %575 = vrcp.f32 %v235_v48  ;;  %v260_v60 = vand.u32 2147483647, %v235_v48  ;;  %vm241_vm10 = vweird.f32 %v816_v47  ;;  %vm256_vm12 = vweird.f32 %v235_v48 }
  0xb1   : > { %v248_v62 = vor.u32 1.1754944e-38, %v247_v54  ;;  %vm246_vm13 = vcmp.eq.f32.partialorder %v245_v57, 8.507059e+37  ;;  %v263_v4 = vor.u32 1.1754944e-38, %v262_v58  ;;  %v327_v33 = vmul.f32 %v235_v48, %v806_v18 }
  0xb2   : > { %vm261_vm15 = vcmp.eq.f32.partialorder %v260_v60, 8.507059e+37  ;;  %v326_v35 = vmul.f32 %v325_v34, %v816_v47 }
  0xb5   : > { %v574_v49 = vpop.eup %573 }
  0xb6   : > { %v576_v50 = vpop.eup %575  ;;  %v237_v51 = vmul.f32 %v574_v49, %v816_v47  ;;  %vm242_vm8 = vweird.f32 %v574_v49 }
  0xb7   : > { %v252_v52 = vmul.f32 %v576_v50, %v235_v48  ;;  %vm257_vm9 = vweird.f32 %v576_v50  ;;  %vm243_vm11 = vmor %vm241_vm10, %vm242_vm8 }
  0xb8   : > { %v238_v53 = vsub.f32 1.0, %v237_v51  ;;  %vm258_vm14 = vmor %vm256_vm12, %vm257_vm9 }
  0xb9   : > { %v253_v55 = vsub.f32 1.0, %v252_v52 }
  0xba   : > { %v239_v56 = vmul.f32 %v574_v49, %v238_v53 }
  0xbb   : > { %v254_v59 = vmul.f32 %v576_v50, %v253_v55 }
  0xbc   : > { %v240_v61 = vadd.f32 %v574_v49, %v239_v56 }
  0xbd   : > { %v255_v63 = vadd.f32 %v576_v50, %v254_v59 }
  0xbe   : > { %v244_v3 = vsel %vm243_vm11, %v574_v49, %v240_v61 }
  0xbf   : > { %v249_v5 = vsel %vm246_vm13, %v248_v62, %v244_v3  ;;  %v259_v6 = vsel %vm258_vm14, %v576_v50, %v255_v63 }
  0xc0   : > { %277 = vperm.xlu1 %566, %v249_v5   ;;  %v267_v7 = vmul.f32 %v266_v2, %v249_v5  ;;  %v264_v8 = vsel %vm261_vm15, %v263_v4, %v259_v6 }
  0xc1   : > { %v271_v9 = vmul.f32 %v266_v2, %v264_v8 }
  0xc2   : > { %v457_v10 = vclamps-f32 %v267_v7, 10000.0 }
  0xc3   : > { %v458_v11 = vclamps-f32 %v271_v9, 10000.0 }
  0xc4   : > { %v472_v12 = vcvt.f32.s32 %v457_v10  ;;  %v470_v19 = vand.u32 2147483647, %v457_v10  ;;  %v475_v21 = vand.u32 2147483648, %v457_v10 }
  0xc5   : > { %v480_v13 = vcvt.f32.s32 %v458_v11  ;;  %v478_v22 = vand.u32 2147483647, %v458_v11  ;;  %v483_v23 = vand.u32 2147483648, %v458_v11 }
  0xc6   : > { %v473_v14 = vcvt.s32.f32 %v472_v12  ;;  %vm471_vm0 = vcmp.lt.f32.partialorder %v470_v19, 8388608.0 }
  0xc7   : > { %v481_v15 = vcvt.s32.f32 %v480_v13  ;;  %vm479_vm1 = vcmp.lt.f32.partialorder %v478_v22, 8388608.0 }
  0xc8   : > { %v474_v20 = vand.u32 2147483647, %v473_v14  ;;  %302 = vperm.xlu1 %566, %v264_v8  }
  0xc9   : > { %v482_v24 = vand.u32 2147483647, %v481_v15 }
  0xca   : > { %v476_v25 = vor.u32 %v475_v21, %v474_v20 }
  0xcb   : > { %v484_v26 = vor.u32 %v483_v23, %v482_v24 }
  0xcc   : > { %v477_v27 = vsel %vm471_vm0, %v476_v25, %v457_v10 }
  0xcd   : > { %v285_v28 = vsub.f32 %v800_v16, %v477_v27  ;;  %v284_v29 = vsub.f32 0.0, %v477_v27  ;;  %v485_v30 = vsel %vm479_vm1, %v484_v26, %v458_v11 }
  0xce   : > { %v310_v31 = vsub.f32 %v802_v17, %v485_v30  ;;  %v309_v32 = vsub.f32 0.0, %v485_v30 }
  0xcf   : > { %295 = vperm.xlu0 %568, %v285_v28   ;;  %288 = vperm.xlu2 %567, %v284_v29  }
  0xd0   : > { %320 = vperm.xlu1 %566, %v310_v31  }
  0xd7   : > { %313 = vperm.xlu2 %567, %v309_v32  }
  0xd8   : > { %337 = vperm.xlu1 %566, %v327_v33  }
  0xdf   : > { %330 = vperm.xlu2 %567, %v326_v35  }
 0x129   : > { %v289_v39 = vpop.permute.xlu2 %288 }
 0x131   : > { %v314_v56 = vpop.permute.xlu2 %313 }
 0x132   : > { %v278_v36 = vpop.permute.xlu1 %277 }
 0x133   : > { %v280_v16 = vmul.f32 %v278_v36, %v787_v0  ;;  %v281_v37 = vmul.f32 %v278_v36, %v789_v1 }
 0x135   : > { %v488_v38 = vcvt.f32.s32 %v280_v16  ;;  %v496_v17 = vcvt.f32.s32 %v281_v37  ;;  %v491_v46 = vand.u32 2147483648, %v280_v16  ;;  %v499_v47 = vand.u32 2147483648, %v281_v37 }
 0x136   : > { %v486_v48 = vand.u32 2147483647, %v280_v16  ;;  %v494_v49 = vand.u32 2147483647, %v281_v37 }
 0x137   : > { %v489_v40 = vcvt.s32.f32 %v488_v38  ;;  %v497_v41 = vcvt.s32.f32 %v496_v17 }
 0x138   : > { %vm832_vm2 = vcmp.lt.f32.partialorder %v486_v48, 8388608.0  ;;  %vm836_vm3 = vcmp.lt.f32.partialorder %v494_v49, 8388608.0 }
 0x139   : > { %v490_v43 = vand.u32 2147483647, %v489_v40  ;;  %v498_v44 = vand.u32 2147483647, %v497_v41  ;;  %v331_v20 = vpop.permute.xlu2 %330 }
 0x13a   : > { %v303_v42 = vpop.permute.xlu1 %302 }
 0x13b   : > { %v305_v45 = vmul.f32 %v303_v42, %v787_v0  ;;  %v306_v18 = vmul.f32 %v303_v42, %v789_v1  ;;  %v492_v52 = vor.u32 %v491_v46, %v490_v43  ;;  %v500_v53 = vor.u32 %v499_v47, %v498_v44 }
 0x13d   : > { %v504_v50 = vcvt.f32.s32 %v305_v45  ;;  %v512_v51 = vcvt.f32.s32 %v306_v18  ;;  %v502_v0 = vand.u32 2147483647, %v305_v45  ;;  %v510_v1 = vand.u32 2147483647, %v306_v18 }
 0x13e   : > { %v507_v60 = vand.u32 2147483648, %v305_v45  ;;  %v515_v62 = vand.u32 2147483648, %v306_v18  ;;  %v493_v63 = vsel %vm832_vm2, %v492_v52, %v280_v16  ;;  %v501_v2 = vsel %vm836_vm3, %v500_v53, %v281_v37 }
 0x13f   : > { %v505_v54 = vcvt.s32.f32 %v504_v50  ;;  %v513_v55 = vcvt.s32.f32 %v512_v51  ;;  %vm503_vm4 = vcmp.lt.f32.partialorder %v502_v0, 8388608.0  ;;  %vm511_vm5 = vcmp.lt.f32.partialorder %v510_v1, 8388608.0 }
 0x140   : > { %v291_v7 = vmax.f32 %v289_v39, %v493_v63  ;;  %v292_v8 = vmax.f32 %v289_v39, %v501_v2 }
 0x141   : > { %v506_v59 = vand.u32 2147483647, %v505_v54  ;;  %v514_v61 = vand.u32 2147483647, %v513_v55  ;;  %v296_v6 = vpop.permute.xlu0 %295 }
 0x142   : > { %v321_v3 = vpop.permute.xlu1 %320  ;;  %v298_v13 = vmin.f32 %v296_v6, %v291_v7  ;;  %v299_v14 = vmin.f32 %v296_v6, %v292_v8 }
 0x143   : > { %v508_v4 = vor.u32 %v507_v60, %v506_v59  ;;  %v516_v5 = vor.u32 %v515_v62, %v514_v61 }
 0x144   : > { %v333_v22 = vmul.f32 %v331_v20, %v298_v13  ;;  %v334_v23 = vmul.f32 %v331_v20, %v299_v14 }
 0x145   : > { %v509_v9 = vsel %vm503_vm4, %v508_v4, %v305_v45  ;;  %v517_v10 = vsel %vm511_vm5, %v516_v5, %v306_v18 }
 0x146   : > { %v316_v11 = vmax.f32 %v314_v56, %v509_v9  ;;  %v317_v12 = vmax.f32 %v314_v56, %v517_v10 }
 0x148   : > { %v323_v15 = vmin.f32 %v321_v3, %v316_v11  ;;  %v324_v19 = vmin.f32 %v321_v3, %v317_v12 }
 0x14a   : > { %v338_v21 = vpop.permute.xlu1 %337 }
 0x14b   : > { %v340_v24 = vmul.f32 %v338_v21, %v323_v15  ;;  %v341_v25 = vmul.f32 %v338_v21, %v324_v19 }
 0x14d   : > { %v342_v26 = vadd.f32 %v340_v24, %v333_v22  ;;  %v343_v27 = vadd.f32 %v341_v25, %v334_v23 }
 0x14f   : > { %344 = vst [vmem:[%s174_s13] sm:$0xff] %v342_v26 }
 0x150   : > { %345 = vst [vmem:[%s174_s13 + $0x8] sm:$0xff] %v343_v27 }
 0x151   : > { %634 = shalt.err (!%p631_p5)
}
 0x152   : > { %520 = dma.vmem_to_hbm [thread:$0]  (%p741_p10), %s361_s7, 256, %s363_s8, %s347_s14  }
 0x153 PF: > { %p531_p7 = scmp.ge.s32.totalorder %s673_s12, 2  ;;  %s374_s23 = sand.u32 1, %s661_s9  }
 0x154   : > { %s375_s28 = scalar_lea.sflag [#allocation4], %s374_s23 }
 0x155   : > { %p527_p8 = pnand %p531_p7, %p745_p11 }
 0x157   : > { %p528_p9 = pneg %p527_p8 }
 0x159   : > { %656 = dma.done.wait (%p528_p9), %s375_s28, 256  }
 0x15a   : > { %658 = vsyncadd (%p528_p9), %s375_s28, 4294967040  ;;  %p15_p1 = scmp.ge.s32.totalorder %s717_s15, 6   ;;  %s890_s9 = smov %s665_s10 }
 0x15b   : > { %s891_s10 = smov %s669_s11  ;;  %s892_s11 = smov %s729_s18 }
 0x15c   : > { %s893_s12 = smov %s717_s15  ;;  %17 = sbr.rel (!%p15_p1) target bundleno = 5 (0x5), region = 76 }
 0x161   :  { %381 = vsyncpa [#allocation3], 1 }
 0x162   :  { %383 = vsyncpa [#allocation3 + $0x1], 1 }
 0x163   :  { %384 = vsyncpa [#allocation4], 1 }
 0x164   :  { %386 = vsyncpa [#allocation4 + $0x1], 1 }

</bundles_post_ra>
